<compile_context>
chip_gen: v6e
topology: v6e:2x2x1
jax: 0.10.0
libtpu: 0.0.40
codegen_flags: <defaults>
</compile_context>

<pallas_src>
import functools

import jax
import jax.numpy as jnp
import numpy as np
from jax.experimental import pallas as pl
from jax.experimental.pallas import tpu as pltpu


# --------------------------------------------------------------------------- #
# One-time pltpu.roll direction probe                                          #
# --------------------------------------------------------------------------- #
@functools.lru_cache(maxsize=None)
def _roll_matches_jnp_roll() -> bool:
    """Does pltpu.roll follow jnp.roll's shift direction?

    The fused conv kernel needs "bring x[f + s] into lane f".  Getting the
    rotation sign wrong would silently compute a 180-degree-flipped kernel, so
    the convention is verified once at startup with a 4 KiB probe kernel.
    """
    def probe(x_ref, o_ref):
        o_ref[...] = pltpu.roll(x_ref[...], 1, axis=1)

    x = jnp.broadcast_to(jnp.arange(128, dtype=jnp.float32)[None, :], (8, 128))
    y = pl.pallas_call(
        probe, out_shape=jax.ShapeDtypeStruct((8, 128), jnp.float32))(x)
    # jnp.roll(x, 1) puts x[..., -1] (= 127) at lane 0.
    return int(jax.device_get(y[0, 0])) == 127


# --------------------------------------------------------------------------- #
# Fused ConvBlock kernel                                                       #
# --------------------------------------------------------------------------- #
def _make_conv_block_kernel(wp: int, lp: int, roll_is_jnp: bool):
    # Flat-lane offsets of the 9 taps of a 3x3 kernel on the (hp x wp) grid.
    offsets = tuple(di * wp + dj for di in range(3) for dj in range(3))

    def shift_flat(a, s):
        # b[:, f] = a[:, (f + s) % lp].  Circular wrap only pollutes lanes that
        # the wrapper crops away, so it is harmless.
        if s == 0:
            return a
        amt = (lp - s) if roll_is_jnp else s
        return pltpu.roll(a, amt, axis=1)

    def kernel(x_ref, w1_ref, b1_ref, w2_ref, b2_ref, w3_ref, b3_ref, o_ref):
        x = x_ref[0]                                          # (C_in, Lp) f32

        # conv1: 3x3 (the pad=1 ring was folded into the wrapper's pre-pad).
        cols = jnp.concatenate([shift_flat(x, s) for s in offsets], axis=0)
        y = jnp.dot(w1_ref[...], cols.astype(jnp.bfloat16),
                    preferred_element_type=jnp.float32)
        y = jnp.maximum(y + b1_ref[...], 0.0)                 # (C_out, Lp) f32

        # conv2: 1x1 -> just another matmul on the resident slab.
        y2 = jnp.dot(w2_ref[...], y.astype(jnp.bfloat16),
                     preferred_element_type=jnp.float32)
        y2 = jnp.maximum(y2 + b2_ref[...], 0.0)

        # conv3: 3x3, valid.
        cols = jnp.concatenate([shift_flat(y2, s) for s in offsets], axis=0)
        y3 = jnp.dot(w3_ref[...], cols.astype(jnp.bfloat16),
                     preferred_element_type=jnp.float32)
        y3 = jnp.maximum(y3 + b3_ref[...], 0.0)

        o_ref[...] = y3[None].astype(o_ref.dtype)             # lane-dense store

    return kernel


# --------------------------------------------------------------------------- #
# Parameter packing (hoisted out of the forward path)                          #
# --------------------------------------------------------------------------- #
def pack_params(params):
    """One-time relayout of PyTorch-style conv params into kernel layout."""
    def pack_3x3(w):  # OIHW -> (C_out, 9*C_in); columns ordered (di, dj, ci)
        co, ci, kh, kw = w.shape
        return jnp.transpose(w, (0, 2, 3, 1)).reshape(co, kh * kw * ci)

    return {
        "w1": pack_3x3(params["w1"]).astype(jnp.bfloat16),
        "b1": params["b1"].reshape(-1, 1).astype(jnp.float32),
        "w2": params["w2"].reshape(params["w2"].shape[0], -1).astype(jnp.bfloat16),
        "b2": params["b2"].reshape(-1, 1).astype(jnp.float32),
        "w3": pack_3x3(params["w3"]).astype(jnp.bfloat16),
        "b3": params["b3"].reshape(-1, 1).astype(jnp.float32),
    }


# --------------------------------------------------------------------------- #
# Public forward                                                               #
# --------------------------------------------------------------------------- #
def conv_block_forward(x_nchw, packed):
    n, c_in, h, w = x_nchw.shape
    c_out = packed["w2"].shape[0]
    hp, wp = h + 2, w + 2                    # conv1's padding=1 applied up front
    lp_raw = hp * wp
    lp = ((lp_raw + 127) // 128) * 128       # round flat axis up to full lanes

    # Spatial zero-pad (+1 ring) and flatten H*W onto a single lane-dense axis.
    # Pure pad + reshape: no transpose, no im2col expansion, stays NCHW.
    xp = jnp.pad(x_nchw, ((0, 0), (0, 0), (1, 1), (1, 1)))
    x_flat = jnp.pad(xp.reshape(n, c_in, lp_raw),
                     ((0, 0), (0, 0), (0, lp - lp_raw)))

    kernel = _make_conv_block_kernel(wp, lp, _roll_matches_jnp_roll())

    out_flat = pl.pallas_call(
        kernel,
        out_shape=jax.ShapeDtypeStruct((n, c_out, lp), jnp.float32),
        grid=(n,),
        in_specs=[
            pl.BlockSpec((1, c_in, lp), lambda b: (b, 0, 0)),       # x
            pl.BlockSpec((c_out, 9 * c_in), lambda b: (0, 0)),      # w1
            pl.BlockSpec((c_out, 1), lambda b: (0, 0)),             # b1
            pl.BlockSpec((c_out, c_out), lambda b: (0, 0)),         # w2
            pl.BlockSpec((c_out, 1), lambda b: (0, 0)),             # b2
            pl.BlockSpec((c_out, 9 * c_out), lambda b: (0, 0)),     # w3
            pl.BlockSpec((c_out, 1), lambda b: (0, 0)),             # b3
        ],
        out_specs=pl.BlockSpec((1, c_out, lp), lambda b: (b, 0, 0)),
        compiler_params=pltpu.CompilerParams(
            dimension_semantics=("parallel",)),
    )(x_flat, packed["w1"], packed["b1"], packed["w2"], packed["b2"],
      packed["w3"], packed["b3"])

    # conv3's valid outputs live at flat index i*wp + j (i < h-2, j < w-2) on
    # the padded grid; recover them with a free reshape + cheap slice.
    ho, wo = h - 2, w - 2
    return out_flat[:, :, :lp_raw].reshape(n, c_out, hp, wp)[:, :, :ho, :wo]


# --------------------------------------------------------------------------- #
# Init + reference + self-test                                                 #
# --------------------------------------------------------------------------- #
def init_params(key, channels_in, channels_out):
    # Deterministic init mimicking PyTorch's default U(-1/sqrt(fan_in), +...).
    ks = jax.random.split(key, 6)

    def u(k, shape, fan_in):
        bound = 1.0 / np.sqrt(fan_in)
        return jax.random.uniform(k, shape, jnp.float32, -bound, bound)

    return {
        "w1": u(ks[0], (channels_out, channels_in, 3, 3), channels_in * 9),
        "b1": u(ks[1], (channels_out,), channels_in * 9),
        "w2": u(ks[2], (channels_out, channels_out, 1, 1), channels_out),
        "b2": u(ks[3], (channels_out,), channels_out),
        "w3": u(ks[4], (channels_out, channels_out, 3, 3), channels_out * 9),
        "b3": u(ks[5], (channels_out,), channels_out * 9),
    }


def _reference(x, params):
    def conv(x, w, b, pad):
        y = jax.lax.conv_general_dilated(
            x, w, window_strides=(1, 1), padding=[(pad, pad), (pad, pad)],
            dimension_numbers=("NCHW", "OIHW", "NCHW"))
        return jax.nn.relu(y + b[None, :, None, None])

    x = conv(x, params["w1"], params["b1"], 1)
    x = conv(x, params["w2"], params["b2"], 0)
    x = conv(x, params["w3"], params["b3"], 0)
    return x


if __name__ == "__main__":
    key = jax.random.PRNGKey(0)
    kx, kp = jax.random.split(key)

    N, C_in, C_out, H, W = 2, 4, 8, 16, 16
    x = jax.random.normal(kx, (N, C_in, H, W), dtype=jnp.float32)
    params = init_params(kp, C_in, C_out)
    packed = pack_params(params)          # one-time weight relayout (hoisted)

    _ = _roll_matches_jnp_roll()          # warm the roll-direction probe cache

    fwd = jax.jit(conv_block_forward)
    out = jax.block_until_ready(fwd(x, packed))

    # conv1 (pad=1) keeps 16, conv2 (1x1) keeps 16, conv3 (3x3 valid) -> 14.
    assert out.shape == (N, C_out, H - 2, W - 2), out.shape

    expected = jax.block_until_ready(_reference(x, params))
    np.testing.assert_allclose(np.asarray(out), np.asarray(expected),
                               atol=2e-2, rtol=2e-2)

    print("KERNEL_OK")
</pallas_src>

<mosaic_0001>
module attributes {stable_mosaic.version = 11 : i64} {
  func.func @probe(%arg0: memref<8x128xf32, #tpu.memory_space<vmem>>, %arg1: memref<8x128xf32, #tpu.memory_space<vmem>>) attributes {dimension_semantics = [], scalar_prefetch = 0 : i64, scratch_operands = 0 : i64, tpu.core_type = #tpu.core_type<tc>} {
    %c0 = arith.constant 0 : index
    %c0_0 = arith.constant 0 : index
    %0 = vector.load %arg0[%c0, %c0_0] : memref<8x128xf32, #tpu.memory_space<vmem>>, vector<8x128xf32>
    %c1_i32 = arith.constant 1 : i32
    %1 = tpu.dynamic_rotate %0 by %c1_i32 dim 1 : vector<8x128xf32>, i32 -> vector<8x128xf32>
    %c0_1 = arith.constant 0 : index
    %c0_2 = arith.constant 0 : index
    %2 = vector.load %arg1[%c0_1, %c0_2] : memref<8x128xf32, #tpu.memory_space<vmem>>, vector<8x128xf32>
    tpu.vector_store %arg1[%c0_1, %c0_2], %1 {strides = array<i32>} : memref<8x128xf32, #tpu.memory_space<vmem>>, vector<8x128xf32>,
    return
  }
}

</mosaic_0001>

<bundles_post_ra>
// kernel: tpu_custom_call.1
= control target key start
LH: loop header
LB: loop body
LE: loop exit
PB: predicated region body
PF: predicated region fallthrough
CT: control target
= control target key end

     0   :  { %6 = vsyncpa [#allocation3], 0  ;;  %s106_s0 = inlined_call_operand.hbm [shape: f32[8,128], index: 0, kind: input, shape index: {}]   ;;  %s107_s1 = inlined_call_operand.hbm [shape: f32[8,128], index: 1, kind: output, shape index: {}]  }
   0x1   :  { %7 = vsyncpa [#allocation4], 0  ;;  %s87_s6 = smov [#allocation2]  }
   0x2   :  { %s14_s7 = sshll.u32 %s87_s6, 4  ;;  %s15_s7 = int_to_ptr.vmem [resolvable:$true] %s14_s7 }
   0x3   :  { %s51_s8 = scalar_lea.vmem %s15_s7, 128  ;;  %p56_p1 = scmp.lt.s32.totalorder %s15_s7, %s15_s7 }
   0x4   :  { %p52_p0 = scmp.ne.s32.totalorder %s15_s7, %s51_s8  ;;  %p57_p2 = scmp.lt.s32.totalorder %s51_s8, %s51_s8 }
   0x6   :  { %p58_p3 = por %p57_p2, %p56_p1 }
   0x8   :  { %p59_p4 = pnand %p58_p3, %p52_p0 }
   0xa   :  { %62 = shalt.err (!%p59_p4)
}
   0xb   :  { %17 = dma.hbm_to_vmem [thread:$0]  %s106_s0, 128, %s15_s7, [#allocation3]  }
   0xc   :  { %83 = dma.done.wait [#allocation3], 128  }
   0xd   :  { %84 = vsyncadd [#allocation3], 4294967168  ;;  %v21_v0 = vld [vmem:[#allocation2] sm:$0xff]  ;;  %s88_s11 = smov 1   ;;  %s89_s12 = smov [#allocation5]  }
   0xe   :  { %22 = vrot.lane.b32.xlu0 %v21_v0, %s88_s11  ;;  %s31_s13 = sshll.u32 %s89_s12, 4  ;;  %s32_s13 = int_to_ptr.vmem [resolvable:$true] %s31_s13 }
   0xf   :  { %s63_s14 = scalar_lea.vmem %s32_s13, 128  ;;  %p68_p6 = scmp.lt.s32.totalorder %s32_s13, %s32_s13 }
  0x10   :  { %p64_p5 = scmp.ne.s32.totalorder %s32_s13, %s63_s14  ;;  %p69_p7 = scmp.lt.s32.totalorder %s63_s14, %s63_s14 }
  0x12   :  { %p70_p8 = por %p69_p7, %p68_p6 }
  0x14   :  { %p71_p9 = pnand %p70_p8, %p64_p5 }
  0x80   :  { %v23_v1 = vpop.permute.xlu0 %22 }
  0x81   :  { %24 = vst [vmem:[#allocation5] sm:$0xff] %v23_v1 }
  0x82   :  { %74 = shalt.err (!%p71_p9)
}
  0x83   :  { %34 = dma.vmem_to_hbm [thread:$0]  %s32_s13, 128, %s107_s1, [#allocation4]  }
  0x84   :  { %85 = dma.done.wait [#allocation4], 128  }
  0x85   :  { %86 = vsyncadd [#allocation4], 4294967168 }
  0x86   :  { %38 = vsyncpa [#allocation3], 1 }
  0x87   :  { %39 = vsyncpa [#allocation4], 1 }

</bundles_post_ra>
